<compile_context>
chip_gen: v7x
topology: tpu7x:2x2x1
jax: 0.10.0
libtpu: 0.0.40
codegen_flags: <defaults>
</compile_context>

<pallas_src>
import jax
import jax.numpy as jnp
from jax.experimental import pallas as pl
from jax.experimental.pallas import tpu as pltpu


def classifier_kernel(x_ref, w1_ref, b1_ref, w2_ref, b2_ref, o_ref):
    # x_ref: (TN, C, T*V) tile; weights/biases are fully resident.
    x = x_ref[...]

    # MaxPool2d((T, V)) == global max over the flattened (T*V) lane axis.
    pooled = jnp.max(x, axis=-1)  # (TN, C)

    # linear1: (TN, C) @ (C, L) + (1, L)   (f32 accumulation)
    h = jnp.dot(pooled, w1_ref[...], preferred_element_type=jnp.float32)
    h = h + b1_ref[...]

    # dropout: identity at inference time (eval-mode nn.Dropout)
    # TODO(synk): training-mode dropout (random mask + 1/(1-p) scaling) not implemented.

    # ReLU
    h = jnp.maximum(h, 0.0)

    # fc_cls: (TN, L) @ (L, num_classes) + (1, num_classes)
    out = jnp.dot(h, w2_ref[...], preferred_element_type=jnp.float32)
    out = out + b2_ref[...]

    o_ref[...] = out.astype(o_ref.dtype)


def _round_up(v, m):
    return (v + m - 1) // m * m


def classifier_forward(x, w1, b1, w2, b2):
    """x: (N, M, C, T, V) with M == 1. Returns (N, num_classes) float32."""
    N, M, C, T, V = x.shape
    assert M == 1, "reshape(N, C, T, V) in the reference implies M == 1"
    TV = T * V
    L = w1.shape[1]
    num_classes = w2.shape[1]

    # Fold (T, V) into one lane-dense reduction axis (free, wrapper-side).
    x_flat = x.reshape(N, C, TV)

    dtype_bytes = jnp.dtype(x.dtype).itemsize
    c_pad = _round_up(C, 8)
    tv_pad = _round_up(TV, 128)
    row_bytes = c_pad * tv_pad * dtype_bytes  # VMEM bytes per batch row of x

    # Size the N tile so the double-buffered x tile fits a budget that works on
    # v5e/v6e (128 MiB physical) AND v7x (64 MiB physical, 32 MiB scoped default).
    x_budget = 24 * 1024 * 1024  # bytes for the two x-tile buffers
    tn = max(8, (x_budget // (2 * row_bytes)) // 8 * 8)
    n_pad = _round_up(max(N, 8), 8)
    tn = min(tn, n_pad)
    n_pad = _round_up(n_pad, tn)

    if n_pad != N:
        x_flat = jnp.pad(x_flat, ((0, n_pad - N), (0, 0), (0, 0)))

    grid = (n_pad // tn,)

    # VMEM accounting: double-buffered x tile + resident (padded) weights/bias
    # + double-buffered out tile + headroom.
    w_bytes = (
        c_pad * _round_up(L, 128)
        + 8 * _round_up(L, 128)
        + _round_up(L, 8) * _round_up(num_classes, 128)
        + 8 * _round_up(num_classes, 128)
    ) * 4
    out_bytes = tn * _round_up(num_classes, 128) * 4
    vmem_limit = 2 * tn * row_bytes + 2 * w_bytes + 2 * out_bytes + (8 << 20)
    vmem_limit = int(max(vmem_limit, 16 << 20))

    cost = pl.CostEstimate(
        flops=2 * N * (C * L + L * num_classes),
        transcendentals=0,
        bytes_accessed=(
            x_flat.size * dtype_bytes
            + (w1.size + b1.size + w2.size + b2.size) * 4
            + n_pad * num_classes * 4
        ),
    )

    out = pl.pallas_call(
        classifier_kernel,
        out_shape=jax.ShapeDtypeStruct((n_pad, num_classes), jnp.float32),
        grid_spec=pltpu.PrefetchScalarGridSpec(
            num_scalar_prefetch=0,
            grid=grid,
            in_specs=[
                pl.BlockSpec((tn, C, TV), lambda i: (i, 0, 0)),
                pl.BlockSpec((C, L), lambda i: (0, 0)),
                pl.BlockSpec((1, L), lambda i: (0, 0)),
                pl.BlockSpec((L, num_classes), lambda i: (0, 0)),
                pl.BlockSpec((1, num_classes), lambda i: (0, 0)),
            ],
            out_specs=pl.BlockSpec((tn, num_classes), lambda i: (i, 0)),
        ),
        compiler_params=pltpu.CompilerParams(
            dimension_semantics=("parallel",),
            vmem_limit_bytes=vmem_limit,
        ),
        cost_estimate=cost,
    )(x_flat, w1, b1, w2, b2)

    return out[:N]


if __name__ == "__main__":
    # Small shapes consistent with the module (in_channels=C, latent_dim=L,
    # T == compressed_T_dim, V == 17 so the MaxPool2d window covers the whole
    # spatial extent exactly).
    N, M, C, T, V = 2, 1, 32, 8, 17
    latent_dim = 64
    num_classes = 4
    init_std = 0.01

    key = jax.random.PRNGKey(0)
    kx, kw1, kw2 = jax.random.split(key, 3)

    x = jax.random.normal(kx, (N, M, C, T, V), dtype=jnp.float32)

    # normal_init(std=0.01, bias=0); weights stored transposed (in, out).
    w1 = init_std * jax.random.normal(kw1, (C, latent_dim), dtype=jnp.float32)
    b1 = jnp.zeros((1, latent_dim), dtype=jnp.float32)
    w2 = init_std * jax.random.normal(kw2, (latent_dim, num_classes), dtype=jnp.float32)
    b2 = jnp.zeros((1, num_classes), dtype=jnp.float32)

    cls_score = classifier_forward(x, w1, b1, w2, b2)
    jax.block_until_ready(cls_score)

    # Pure-JAX reference check (same math, no Pallas).
    pooled_ref = jnp.max(x.reshape(N, C, T, V), axis=(2, 3))
    h_ref = jnp.maximum(pooled_ref @ w1 + b1, 0.0)
    ref = h_ref @ w2 + b2
    assert cls_score.shape == (N, num_classes)
    assert jnp.allclose(cls_score, ref, atol=1e-5), "mismatch vs JAX reference"

    print("KERNEL_OK")
</pallas_src>

<mosaic_0001>
module attributes {stable_mosaic.version = 11 : i64} {
  func.func @classifier_kernel(%arg0: i32, %arg1: memref<8x32x136xf32, #tpu.memory_space<vmem>>, %arg2: memref<32x64xf32, #tpu.memory_space<vmem>>, %arg3: memref<1x64xf32, #tpu.memory_space<vmem>>, %arg4: memref<64x4xf32, #tpu.memory_space<vmem>>, %arg5: memref<1x4xf32, #tpu.memory_space<vmem>>, %arg6: memref<8x4xf32, #tpu.memory_space<vmem>>) attributes {dimension_semantics = [#tpu.dimension_semantics<parallel>], iteration_bounds = array<i64: 1>, scalar_prefetch = 0 : i64, scratch_operands = 0 : i64, tpu.core_type = #tpu.core_type<tc>, window_params = [{transform_indices = @transform_0, window_bounds = array<i64: 8, 32, 136>}, {pipeline_mode = #tpu.pipeline_mode<synchronous>, transform_indices = @transform_1, window_bounds = array<i64: 32, 64>}, {pipeline_mode = #tpu.pipeline_mode<synchronous>, transform_indices = @transform_2, window_bounds = array<i64: 1, 64>}, {pipeline_mode = #tpu.pipeline_mode<synchronous>, transform_indices = @transform_3, window_bounds = array<i64: 64, 4>}, {pipeline_mode = #tpu.pipeline_mode<synchronous>, transform_indices = @transform_4, window_bounds = array<i64: 1, 4>}, {transform_indices = @transform_5, window_bounds = array<i64: 8, 4>}]} {
    %c0 = arith.constant 0 : index
    %c0_0 = arith.constant 0 : index
    %c0_1 = arith.constant 0 : index
    %0 = vector.load %arg1[%c0, %c0_0, %c0_1] : memref<8x32x136xf32, #tpu.memory_space<vmem>>, vector<8x32x136xf32>
    %cst = arith.constant dense<0xFF800000> : vector<8x32xf32>
    %1 = vector.multi_reduction <maximumf>, %0, %cst [2] : vector<8x32x136xf32> to vector<8x32xf32>
    %c0_2 = arith.constant 0 : index
    %c0_3 = arith.constant 0 : index
    %2 = vector.load %arg2[%c0_2, %c0_3] : memref<32x64xf32, #tpu.memory_space<vmem>>, vector<32x64xf32>
    %cst_4 = arith.constant dense<0.000000e+00> : vector<8x64xf32>
    %3 = tpu.matmul %1, %2, %cst_4 {dimension_numbers = #tpu.dot_dimension_numbers<[1], [0], [0], [1], [0, 0, 1, 1], [], []>} : vector<8x32xf32>, vector<32x64xf32>, vector<8x64xf32> -> vector<8x64xf32>
    %c0_5 = arith.constant 0 : index
    %c0_6 = arith.constant 0 : index
    %4 = vector.load %arg3[%c0_5, %c0_6] : memref<1x64xf32, #tpu.memory_space<vmem>>, vector<1x64xf32>
    %5 = vector.broadcast %4 : vector<1x64xf32> to vector<8x64xf32>
    %6 = arith.addf %3, %5 : vector<8x64xf32>
    %cst_7 = arith.constant 0.000000e+00 : f32
    %7 = vector.broadcast %cst_7 : f32 to vector<8x64xf32>
    %8 = arith.maximumf %6, %7 : vector<8x64xf32>
    %c0_8 = arith.constant 0 : index
    %c0_9 = arith.constant 0 : index
    %9 = vector.load %arg4[%c0_8, %c0_9] : memref<64x4xf32, #tpu.memory_space<vmem>>, vector<64x4xf32>
    %cst_10 = arith.constant dense<0.000000e+00> : vector<8x4xf32>
    %10 = tpu.matmul %8, %9, %cst_10 {dimension_numbers = #tpu.dot_dimension_numbers<[1], [0], [0], [1], [0, 0, 1, 1], [], []>} : vector<8x64xf32>, vector<64x4xf32>, vector<8x4xf32> -> vector<8x4xf32>
    %c0_11 = arith.constant 0 : index
    %c0_12 = arith.constant 0 : index
    %11 = vector.load %arg5[%c0_11, %c0_12] : memref<1x4xf32, #tpu.memory_space<vmem>>, vector<1x4xf32>
    %12 = vector.broadcast %11 : vector<1x4xf32> to vector<8x4xf32>
    %13 = arith.addf %10, %12 : vector<8x4xf32>
    %c0_13 = arith.constant 0 : index
    %c0_14 = arith.constant 0 : index
    %14 = vector.load %arg6[%c0_13, %c0_14] : memref<8x4xf32, #tpu.memory_space<vmem>>, vector<8x4xf32>
    tpu.vector_store %arg6[%c0_13, %c0_14], %13 {strides = array<i32>} : memref<8x4xf32, #tpu.memory_space<vmem>>, vector<8x4xf32>,
    return
  }
  func.func @transform_0(%arg0: i32) -> (i32, i32, i32) {
    %c0_i32 = arith.constant 0 : i32
    %c0_i32_0 = arith.constant 0 : i32
    %c0_i32_1 = arith.constant 0 : i32
    return %arg0, %c0_i32, %c0_i32_0 : i32, i32, i32
  }
  func.func @transform_1(%arg0: i32) -> (i32, i32) {
    %c0_i32 = arith.constant 0 : i32
    %c0_i32_0 = arith.constant 0 : i32
    %c0_i32_1 = arith.constant 0 : i32
    return %c0_i32, %c0_i32_0 : i32, i32
  }
  func.func @transform_2(%arg0: i32) -> (i32, i32) {
    %c0_i32 = arith.constant 0 : i32
    %c0_i32_0 = arith.constant 0 : i32
    %c0_i32_1 = arith.constant 0 : i32
    return %c0_i32, %c0_i32_0 : i32, i32
  }
  func.func @transform_3(%arg0: i32) -> (i32, i32) {
    %c0_i32 = arith.constant 0 : i32
    %c0_i32_0 = arith.constant 0 : i32
    %c0_i32_1 = arith.constant 0 : i32
    return %c0_i32, %c0_i32_0 : i32, i32
  }
  func.func @transform_4(%arg0: i32) -> (i32, i32) {
    %c0_i32 = arith.constant 0 : i32
    %c0_i32_0 = arith.constant 0 : i32
    %c0_i32_1 = arith.constant 0 : i32
    return %c0_i32, %c0_i32_0 : i32, i32
  }
  func.func @transform_5(%arg0: i32) -> (i32, i32) {
    %c0_i32 = arith.constant 0 : i32
    %c0_i32_0 = arith.constant 0 : i32
    return %arg0, %c0_i32 : i32, i32
  }
}

</mosaic_0001>

<bundles_post_ra>
// kernel: tpu_custom_call.1
= control target key start
LH: loop header
LB: loop body
LE: loop exit
PB: predicated region body
PF: predicated region fallthrough
CT: control target
= control target key end

     0   :  { %10 = vsyncpa [#allocation3], 0  ;;  %s710_s18 = smov [#allocation2]   ;;  %s936_s0 = inlined_call_operand.hbm [shape: f32[8,32,136], index: 0, kind: input, shape index: {}]   ;;  %s937_s1 = inlined_call_operand.vmem [shape: f32[32,64], index: 1, kind: input, shape index: {}]   ;;  %s938_s2 = inlined_call_operand.vmem [shape: f32[1,64], index: 2, kind: input, shape index: {}]   ;;  %s939_s3 = inlined_call_operand.vmem [shape: f32[64,4], index: 3, kind: input, shape index: {}]   ;;  %s940_s4 = inlined_call_operand.vmem [shape: f32[1,4], index: 4, kind: input, shape index: {}]   ;;  %s941_s5 = inlined_call_operand.vmem [shape: f32[8,4], index: 5, kind: output, shape index: {}]  }
   0x1   :  { %s16_s19 = sshll.u32 %s710_s18, 4  ;;  %s686_s22 = scalar_lea.hbm %s936_s0, 8192  ;;  %s17_s19 = int_to_ptr.vmem [resolvable:$true] %s16_s19 }
   0x2   :  { %p687_p0 = scmp.ne.s32.totalorder %s936_s0, %s686_s22  ;;  %p690_p1 = scmp.lt.u32.totalorder %s686_s22, %s936_s0 }
   0x4   :  { %p692_p2 = pnand %p690_p1, %p687_p0 }
   0x6   :  { %695 = shalt.err (!%p692_p2)
}
   0x7   :  { %s696_s27 = scalar_lea.vmem %s17_s19, 8192  ;;  %p701_p4 = scmp.lt.s32.totalorder %s17_s19, %s17_s19 }
   0x8   :  { %p697_p3 = scmp.ne.s32.totalorder %s17_s19, %s696_s27  ;;  %p702_p5 = scmp.lt.s32.totalorder %s696_s27, %s696_s27 }
   0xa   :  { %p703_p6 = por %p702_p5, %p701_p4 }
   0xc   :  { %p704_p7 = pnand %p703_p6, %p697_p3 }
   0xe   :  { %707 = shalt.err (!%p704_p7)
}
   0xf   :  { %s711_s28 = smov 256   ;;  %s712_s29 = smov 16  }
  0x10   :  { %22 = dma.hbm_to_vmem [thread:$0]  %s936_s0, 8192, %s17_s19, [#allocation3], %s711_s28, %s711_s28, %s712_s29  }
  0x11   :  { %708 = dma.done.wait [#allocation3], 8192  }
  0x12   :  { %709 = vsyncadd [#allocation3], 4294959104  ;;  %vm98_vm0 = vcmask 64512   ;;  %v42_v0 = vld [vmem:[#allocation2 + $0x40] sm:$0xff]  ;;  %v43_v1 = vld [vmem:[#allocation2 + $0x48] sm:$0xff]  ;;  %vm714_vm1 = vmmov 0  }
  0x13   :  { %v34_v2 = vld [vmem:[#allocation2] sm:$0xff]  ;;  %v115_v3 = vsel %vm98_vm0, %v43_v1, -inf  ;;  %v35_v4 = vld [vmem:[#allocation2 + $0x8] sm:$0xff]  ;;  %v44_v5 = vld [vmem:[#allocation2 + $0x50] sm:$0xff]  ;;  %vm281_vm2 = vcmask 130112   ;;  %vm288_vm3 = vcmask 195712  }
  0x14   :  { %v45_v6 = vld [vmem:[#allocation2 + $0x58] sm:$0xff]  ;;  %v116_v7 = vmax.f32 %v42_v0, %v115_v3  ;;  %v99_v8 = vsel %vm98_vm0, %v35_v4, -inf  ;;  %v36_v10 = vld [vmem:[#allocation2 + $0x10] sm:$0xff]  ;;  %v47_v14 = vld [vmem:[#allocation2 + $0x68] sm:$0xff]  ;;  %vm295_vm4 = vcmask 261312   ;;  %vm430_vm5 = vcmask 1041409  }
  0x15   :  { %v119_v9 = vsel %vm98_vm0, %v45_v6, -inf  ;;  %v37_v11 = vld [vmem:[#allocation2 + $0x18] sm:$0xff]  ;;  %v100_v12 = vmax.f32 %v34_v2, %v99_v8  ;;  %v39_v15 = vld [vmem:[#allocation2 + $0x28] sm:$0xff]  ;;  %v46_v18 = vld [vmem:[#allocation2 + $0x60] sm:$0xff]  ;;  %v123_v19 = vsel %vm98_vm0, %v47_v14, -inf  ;;  %vm432_vm6 = vcmask 1042434  }
  0x16   :  { %v103_v13 = vsel %vm98_vm0, %v37_v11, -inf  ;;  %117 = vmax.xlane.f32.xlu1 %v116_v7  ;;  %v120_v16 = vmax.f32 %v44_v5, %v119_v9  ;;  %v38_v20 = vld [vmem:[#allocation2 + $0x20] sm:$0xff]  ;;  %v107_v21 = vsel %vm98_vm0, %v39_v15, -inf  ;;  %v53_v22 = vld [vmem:[#allocation2 + $0x98] sm:$0xff]  ;;  %v51_v23 = vld [vmem:[#allocation2 + $0x88] sm:$0xff]  ;;  %v124_v24 = vmax.f32 %v46_v18, %v123_v19 }
  0x17   :  { %101 = vmax.xlane.f32.xlu0 %v100_v12  ;;  %v104_v17 = vmax.f32 %v36_v10, %v103_v13  ;;  %v108_v25 = vmax.f32 %v38_v20, %v107_v21  ;;  %v52_v26 = vld [vmem:[#allocation2 + $0x90] sm:$0xff]  ;;  %v135_v27 = vsel %vm98_vm0, %v53_v22, -inf  ;;  %v50_v28 = vld [vmem:[#allocation2 + $0x80] sm:$0xff]  ;;  %v131_v29 = vsel %vm98_vm0, %v51_v23, -inf  ;;  %v49_v30 = vld [vmem:[#allocation2 + $0x78] sm:$0xff] }
  0x18   :  { %v41_v31 = vld [vmem:[#allocation2 + $0x38] sm:$0xff]  ;;  %v136_v32 = vmax.f32 %v52_v26, %v135_v27  ;;  %v132_v33 = vmax.f32 %v50_v28, %v131_v29  ;;  %v48_v34 = vld [vmem:[#allocation2 + $0x70] sm:$0xff]  ;;  %v127_v35 = vsel %vm98_vm0, %v49_v30, -inf  ;;  %v59_v38 = vld [vmem:[#allocation2 + $0xc8] sm:$0xff]  ;;  %vm434_vm7 = vcmask 1043459  }
  0x19   :  { %v40_v36 = vld [vmem:[#allocation2 + $0x30] sm:$0xff]  ;;  %v111_v37 = vsel %vm98_vm0, %v41_v31, -inf  ;;  %v55_v39 = vld [vmem:[#allocation2 + $0xa8] sm:$0xff]  ;;  %v128_v40 = vmax.f32 %v48_v34, %v127_v35  ;;  %v58_v42 = vld [vmem:[#allocation2 + $0xc0] sm:$0xff]  ;;  %v147_v43 = vsel %vm98_vm0, %v59_v38, -inf  ;;  %vm436_vm8 = vcmask 1044484  }
  0x1a   :  { %121 = vmax.xlane.f32.xlu1 %v120_v16  ;;  %v112_v41 = vmax.f32 %v40_v36, %v111_v37  ;;  %v54_v44 = vld [vmem:[#allocation2 + $0xa0] sm:$0xff]  ;;  %v139_v45 = vsel %vm98_vm0, %v55_v39, -inf  ;;  %v57_v46 = vld [vmem:[#allocation2 + $0xb8] sm:$0xff]  ;;  %v148_v48 = vmax.f32 %v58_v42, %v147_v43  ;;  %v56_v50 = vld [vmem:[#allocation2 + $0xb0] sm:$0xff]  ;;  %vm438_vm9 = vcmask 1045509  }
  0x1b   :  { %105 = vmax.xlane.f32.xlu0 %v104_v17  ;;  %v61_v47 = vld [vmem:[#allocation2 + $0xd8] sm:$0xff]  ;;  %v140_v49 = vmax.f32 %v54_v44, %v139_v45  ;;  %v143_v51 = vsel %vm98_vm0, %v57_v46, -inf  ;;  %v60_v52 = vld [vmem:[#allocation2 + $0xd0] sm:$0xff]  ;;  %v67_v54 = vld [vmem:[#allocation2 + $0x108] sm:$0xff]  ;;  %vm440_vm10 = vcmask 1046534   ;;  %vm442_vm11 = vcmask 1047559  }
  0x1c   :  { %v151_v53 = vsel %vm98_vm0, %v61_v47, -inf  ;;  %v63_v55 = vld [vmem:[#allocation2 + $0xe8] sm:$0xff]  ;;  %v144_v56 = vmax.f32 %v56_v50, %v143_v51  ;;  %v66_v58 = vld [vmem:[#allocation2 + $0x100] sm:$0xff]  ;;  %v163_v59 = vsel %vm98_vm0, %v67_v54, -inf  ;;  %v65_v62 = vld [vmem:[#allocation2 + $0xf8] sm:$0xff]  ;;  %vm444_vm12 = vcmask 261120  }
  0x1d   :  { %v152_v57 = vmax.f32 %v60_v52, %v151_v53  ;;  %v62_v60 = vld [vmem:[#allocation2 + $0xe0] sm:$0xff]  ;;  %v155_v61 = vsel %vm98_vm0, %v63_v55, -inf  ;;  %v69_v63 = vld [vmem:[#allocation2 + $0x118] sm:$0xff]  ;;  %v164_v0 = vmax.f32 %v66_v58, %v163_v59  ;;  %v64_v2 = vld [vmem:[#allocation2 + $0xf0] sm:$0xff]  ;;  %v159_v3 = vsel %vm98_vm0, %v65_v62, -inf }
  0x1e   :  { %125 = vmax.xlane.f32.xlu1 %v124_v24  ;;  %v156_v1 = vmax.f32 %v62_v60, %v155_v61  ;;  %v68_v4 = vld [vmem:[#allocation2 + $0x110] sm:$0xff]  ;;  %v167_v5 = vsel %vm98_vm0, %v69_v63, -inf  ;;  %v75_v6 = vld [vmem:[#allocation2 + $0x148] sm:$0xff]  ;;  %v160_v8 = vmax.f32 %v64_v2, %v159_v3  ;;  %v74_v10 = vld [vmem:[#allocation2 + $0x140] sm:$0xff]  ;;  %v713_v3 = vmov 0.0|0.0  }
  0x1f   :  { %109 = vmax.xlane.f32.xlu0 %v108_v25  ;;  %v71_v7 = vld [vmem:[#allocation2 + $0x128] sm:$0xff]  ;;  %v168_v9 = vmax.f32 %v68_v4, %v167_v5  ;;  %v179_v11 = vsel %vm98_vm0, %v75_v6, -inf  ;;  %v70_v12 = vld [vmem:[#allocation2 + $0x120] sm:$0xff]  ;;  %v73_v14 = vld [vmem:[#allocation2 + $0x138] sm:$0xff]  ;;  %662 = vmatprep.subr.bf16.mxu0 %v713_v3  ;;  %vm533_vm13 = vcmask 523264   ;;  %vm607_vm14 = vcmask 31744  }
  0x20   :  { %v171_v13 = vsel %vm98_vm0, %v71_v7, -inf  ;;  %v77_v15 = vld [vmem:[#allocation2 + $0x158] sm:$0xff]  ;;  %v180_v16 = vmax.f32 %v74_v10, %v179_v11  ;;  %v72_v18 = vld [vmem:[#allocation2 + $0x130] sm:$0xff]  ;;  %v175_v19 = vsel %vm98_vm0, %v73_v14, -inf  ;;  %v83_v22 = vld [vmem:[#allocation2 + $0x188] sm:$0xff]  ;;  %668 = vmatprep.subr.bf16.mxu1 %v713_v3  ;;  %v715_v7 = vmov 0.0  }
  0x21   :  { %v172_v17 = vmax.f32 %v70_v12, %v171_v13  ;;  %v76_v20 = vld [vmem:[#allocation2 + $0x150] sm:$0xff]  ;;  %v183_v21 = vsel %vm98_vm0, %v77_v15, -inf  ;;  %v79_v23 = vld [vmem:[#allocation2 + $0x168] sm:$0xff]  ;;  %v176_v24 = vmax.f32 %v72_v18, %v175_v19  ;;  %v82_v26 = vld [vmem:[#allocation2 + $0x180] sm:$0xff]  ;;  %v195_v27 = vsel %vm98_vm0, %v83_v22, -inf  ;;  %640 = vmatprep.mubr.msk.f32.mxu0 %vm714_vm1, %v715_v7  ;;  %659 = vmatprep.mubr.msk.f32.mxu1 %vm714_vm1, %v715_v7 }
  0x22   :  { %137 = vmax.xlane.f32.xlu1 %v136_v32  ;;  %v184_v25 = vmax.f32 %v76_v20, %v183_v21  ;;  %v78_v28 = vld [vmem:[#allocation2 + $0x160] sm:$0xff]  ;;  %v187_v29 = vsel %vm98_vm0, %v79_v23, -inf  ;;  %v81_v30 = vld [vmem:[#allocation2 + $0x178] sm:$0xff]  ;;  %v196_v32 = vmax.f32 %v82_v26, %v195_v27  ;;  %v80_v34 = vld [vmem:[#allocation2 + $0x170] sm:$0xff] }
  0x23   :  { %133 = vmax.xlane.f32.xlu0 %v132_v33  ;;  %v85_v31 = vld [vmem:[#allocation2 + $0x198] sm:$0xff]  ;;  %v188_v33 = vmax.f32 %v78_v28, %v187_v29  ;;  %v191_v35 = vsel %vm98_vm0, %v81_v30, -inf  ;;  %v84_v36 = vld [vmem:[#allocation2 + $0x190] sm:$0xff]  ;;  %v91_v38 = vld [vmem:[#allocation2 + $0x1c8] sm:$0xff] }
  0x24   :  { %v199_v37 = vsel %vm98_vm0, %v85_v31, -inf  ;;  %v87_v39 = vld [vmem:[#allocation2 + $0x1a8] sm:$0xff]  ;;  %v90_v42 = vld [vmem:[#allocation2 + $0x1c0] sm:$0xff]  ;;  %v211_v43 = vsel %vm98_vm0, %v91_v38, -inf  ;;  %v89_v46 = vld [vmem:[#allocation2 + $0x1b8] sm:$0xff] }
  0x25   :  { %v86_v44 = vld [vmem:[#allocation2 + $0x1a0] sm:$0xff]  ;;  %v203_v45 = vsel %vm98_vm0, %v87_v39, -inf  ;;  %v93_v47 = vld [vmem:[#allocation2 + $0x1d8] sm:$0xff]  ;;  %v88_v50 = vld [vmem:[#allocation2 + $0x1b0] sm:$0xff]  ;;  %v207_v51 = vsel %vm98_vm0, %v89_v46, -inf }
  0x26   :  { %129 = vmax.xlane.f32.xlu1 %v128_v40  ;;  %v192_v40 = vmax.f32 %v80_v34, %v191_v35  ;;  %v92_v52 = vld [vmem:[#allocation2 + $0x1d0] sm:$0xff]  ;;  %v215_v53 = vsel %vm98_vm0, %v93_v47, -inf  ;;  %v97_v54 = vld [vmem:[#allocation2 + $0x1f8] sm:$0xff]  ;;  %v95_v55 = vld [vmem:[#allocation2 + $0x1e8] sm:$0xff] }
  0x27   :  { %113 = vmax.xlane.f32.xlu0 %v112_v41  ;;  %v200_v41 = vmax.f32 %v84_v36, %v199_v37  ;;  %v96_v58 = vld [vmem:[#allocation2 + $0x1f0] sm:$0xff]  ;;  %v223_v59 = vsel %vm98_vm0, %v97_v54, -inf  ;;  %v94_v60 = vld [vmem:[#allocation2 + $0x1e0] sm:$0xff]  ;;  %v219_v61 = vsel %vm98_vm0, %v95_v55, -inf  ;;  %v230_v5 = vld [vmem:[%s937_s1 + $0x18] sm:$0xff] }
  0x28   :  { %v224_v62 = vmax.f32 %v96_v58, %v223_v59  ;;  %v220_v63 = vmax.f32 %v94_v60, %v219_v61  ;;  %v229_v4 = vld [vmem:[%s937_s1 + $0x10] sm:$0xff]  ;;  %v521_v12 = vld [vmem:[%s939_s3 + $0x18] sm:$0xff]  ;;  %v522_v14 = vld [vmem:[%s939_s3 + $0x20] sm:$0xff] }
  0x29   :  { %v666_v6 = vpack.c.bf16 %v230_v5, %v229_v4  ;;  %v520_v10 = vld [vmem:[%s939_s3 + $0x10] sm:$0xff]  ;;  %v523_v15 = vld [vmem:[%s939_s3 + $0x28] sm:$0xff] }
  0x2a   :  { %149 = vmax.xlane.f32.xlu1 %v148_v48  ;;  %v212_v48 = vmax.f32 %v90_v42, %v211_v43  ;;  %v672_v13 = vpack.c.bf16 %v521_v12, %v520_v10 }
  0x2b   :  { %141 = vmax.xlane.f32.xlu0 %v140_v49  ;;  %v204_v49 = vmax.f32 %v86_v44, %v203_v45 }
  0x2e   :  { %145 = vmax.xlane.f32.xlu1 %v144_v56  ;;  %v208_v56 = vmax.f32 %v88_v50, %v207_v51 }
  0x2f   :  { %153 = vmax.xlane.f32.xlu0 %v152_v57  ;;  %v216_v57 = vmax.f32 %v92_v52, %v215_v53 }
  0x32   :  { %165 = vmax.xlane.f32.xlu1 %v164_v0  ;;  %v227_v0 = vld [vmem:[%s937_s1] sm:$0xff] }
  0x33   :  { %157 = vmax.xlane.f32.xlu0 %v156_v1  ;;  %v228_v1 = vld [vmem:[%s937_s1 + $0x8] sm:$0xff] }
  0x34   :  { %v663_v2 = vpack.c.bf16 %v228_v1, %v227_v0 }
  0x36   :  { %161 = vmax.xlane.f32.xlu1 %v160_v8  ;;  %664 = vmatpush3.bf16.msra.mxu0 %v663_v2  ;;  %v518_v8 = vld [vmem:[%s939_s3] sm:$0xff] }
  0x37   :  { %169 = vmax.xlane.f32.xlu0 %v168_v9  ;;  %665 = vmatprep.subr.bf16.mxu0 %v713_v3  ;;  %v519_v9 = vld [vmem:[%s939_s3 + $0x8] sm:$0xff] }
  0x38   :  { %v669_v11 = vpack.c.bf16 %v519_v9, %v518_v8 }
  0x3a   :  { %181 = vmax.xlane.f32.xlu1 %v180_v16  ;;  %667 = vmatpush3.bf16.msra.mxu0 %v666_v6  ;;  %v675_v16 = vpack.c.bf16 %v523_v15, %v522_v14 }
  0x3b   :  { %173 = vmax.xlane.f32.xlu0 %v172_v17  ;;  %670 = vmatpush3.bf16.msra.mxu1 %v669_v11 }
  0x3c   :  { %671 = vmatprep.subr.bf16.mxu1 %v713_v3 }
  0x3e   :  { %177 = vmax.xlane.f32.xlu1 %v176_v24 }
  0x3f   :  { %185 = vmax.xlane.f32.xlu0 %v184_v25  ;;  %673 = vmatpush3.bf16.msra.mxu1 %v672_v13 }
  0x40   :  { %674 = vmatprep.subr.bf16.mxu1 %v713_v3 }
  0x42   :  { %197 = vmax.xlane.f32.xlu1 %v196_v32 }
  0x43   :  { %189 = vmax.xlane.f32.xlu0 %v188_v33  ;;  %676 = vmatpush3.bf16.msra.mxu1 %v675_v16  ;;  %v270_v33 = vlaneseq }
  0x44   :  { %677 = vmatprep.subr.bf16.mxu1 %v713_v3 }
  0x45   :  { %v271_v36 = vand.u32 127, %v270_v33 }
  0x46   :  { %193 = vmax.xlane.f32.xlu1 %v192_v40 }
  0x47   :  { %201 = vmax.xlane.f32.xlu0 %v200_v41  ;;  %v276_v37 = vadd.s32 4294967288, %v271_v36  ;;  %v283_v39 = vadd.s32 4294967280, %v271_v36  ;;  %v273_v41 = vshrl.u32 %v270_v33, 7  ;;  %v290_v42 = vadd.s32 4294967272, %v271_v36 }
  0x49   :  { %v836_v43 = vsub.s32 %v276_v37, %v273_v41  ;;  %v840_v45 = vsub.s32 %v283_v39, %v273_v41  ;;  %v844_v47 = vsub.s32 %v271_v36, %v273_v41 }
  0x4a   :  { %213 = vmax.xlane.f32.xlu1 %v212_v48  ;;  %v846_v48 = vsub.s32 %v290_v42, %v273_v41 }
  0x4b   :  { %205 = vmax.xlane.f32.xlu0 %v204_v49 }
  0x4e   :  { %209 = vmax.xlane.f32.xlu1 %v208_v56 }
  0x4f   :  { %217 = vmax.xlane.f32.xlu0 %v216_v57 }
  0x52   :  { %225 = vmax.xlane.f32.xlu1 %v224_v62 }
  0x53   :  { %221 = vmax.xlane.f32.xlu0 %v220_v63 }
  0xa3   :  { %v118_v17 = vpop.xlane.xlu1 %117 }
  0xa4   :  { %v102_v18 = vpop.xlane.xlu0 %101  ;;  %v300_v55 = vrot.slane %v118_v17, %v844_v47 }
  0xa5   :  { %v275_v56 = vrot.slane %v102_v18, %v844_v47 }
  0xa7   :  { %v122_v19 = vpop.xlane.xlu1 %121 }
  0xa8   :  { %v106_v20 = vpop.xlane.xlu0 %105  ;;  %v304_v49 = vrot.slane %v122_v19, %v836_v43 }
  0xa9   :  { %v280_v50 = vrot.slane %v106_v20, %v836_v43 }
  0xaa   :  { %v305_v59 = vsel %vm281_vm2, %v304_v49, %v300_v55 }
  0xab   :  { %v126_v21 = vpop.xlane.xlu1 %125  ;;  %v282_v60 = vsel %vm281_vm2, %v280_v50, %v275_v56 }
  0xac   :  { %v110_v22 = vpop.xlane.xlu0 %109  ;;  %v309_v52 = vrot.slane %v126_v21, %v840_v45 }
  0xad   :  { %v287_v53 = vrot.slane %v110_v22, %v840_v45 }
  0xae   :  { %v310_v62 = vsel %vm288_vm3, %v309_v52, %v305_v59  ;;  %v525_v59 = vld [vmem:[%s939_s3 + $0x38] sm:$0xff] }
  0xaf   :  { %v138_v23 = vpop.xlane.xlu1 %137  ;;  %v289_v63 = vsel %vm288_vm3, %v287_v53, %v282_v60 }
  0xb0   :  { %v134_v24 = vpop.xlane.xlu0 %133  ;;  %v323_v0 = vrot.slane %v138_v23, %v836_v43 }
  0xb1   :  { %v319_v1 = vrot.slane %v134_v24, %v844_v47 }
  0xb3   :  { %v130_v25 = vpop.xlane.xlu1 %129  ;;  %v324_v8 = vsel %vm281_vm2, %v323_v0, %v319_v1 }
  0xb4   :  { %v114_v26 = vpop.xlane.xlu0 %113  ;;  %v314_v57 = vrot.slane %v130_v25, %v846_v48 }
  0xb5   :  { %v294_v58 = vrot.slane %v114_v26, %v846_v48 }
  0xb6   :  { %v315_v3 = vsel %vm295_vm4, %v314_v57, %v310_v62 }
  0xb7   :  { %v820_v27 = vpop.xlane.xlu1 %149  ;;  %v296_v4 = vsel %vm295_vm4, %v294_v58, %v289_v63 }
  0xb8   :  { %v142_v28 = vpop.xlane.xlu0 %141  ;;  %v431_v9 = vsel %vm430_vm5, %v315_v3, %v296_v4  ;;  %v338_v12 = vrot.slane %v820_v27, %v844_v47 }
  0xb9   :  { %v328_v5 = vrot.slane %v142_v28, %v840_v45 }
  0xbb   :  { %v146_v29 = vpop.xlane.xlu1 %145  ;;  %v329_v13 = vsel %vm288_vm3, %v328_v5, %v324_v8 }
  0xbc   :  { %v822_v30 = vpop.xlane.xlu0 %153  ;;  %v333_v6 = vrot.slane %v146_v29, %v846_v48 }
  0xbd   :  { %v342_v10 = vrot.slane %v822_v30, %v836_v43 }
  0xbe   :  { %v334_v16 = vsel %vm295_vm4, %v333_v6, %v329_v13 }
  0xbf   :  { %v824_v31 = vpop.xlane.xlu1 %165  ;;  %v343_v25 = vsel %vm281_vm2, %v342_v10, %v338_v12 }
  0xc0   :  { %v826_v32 = vpop.xlane.xlu0 %157  ;;  %v357_v20 = vrot.slane %v824_v31, %v844_v47 }
  0xc1   :  { %v347_v14 = vrot.slane %v826_v32, %v840_v45 }
  0xc3   :  { %v828_v34 = vpop.xlane.xlu1 %161  ;;  %v348_v30 = vsel %vm288_vm3, %v347_v14, %v343_v25 }
  0xc4   :  { %v830_v35 = vpop.xlane.xlu0 %169  ;;  %v352_v17 = vrot.slane %v828_v34, %v846_v48 }
  0xc5   :  { %v361_v15 = vrot.slane %v830_v35, %v836_v43 }
  0xc6   :  { %v353_v34 = vsel %vm295_vm4, %v352_v17, %v348_v30 }
  0xc7   :  { %v832_v38 = vpop.xlane.xlu1 %181  ;;  %v362_v31 = vsel %vm281_vm2, %v361_v15, %v357_v20 }
  0xc8   :  { %v834_v40 = vpop.xlane.xlu0 %173  ;;  %v376_v26 = vrot.slane %v832_v38, %v844_v47  ;;  %v433_v38 = vsel %vm432_vm6, %v334_v16, %v431_v9 }
  0xc9   :  { %v366_v18 = vrot.slane %v834_v40, %v840_v45 }
  0xcb   :  { %v838_v44 = vpop.xlane.xlu1 %177  ;;  %v367_v35 = vsel %vm288_vm3, %v366_v18, %v362_v31 }
  0xcc   :  { %v842_v46 = vpop.xlane.xlu0 %185  ;;  %v371_v21 = vrot.slane %v838_v44, %v846_v48 }
  0xcd   :  { %v380_v19 = vrot.slane %v842_v46, %v836_v43 }
  0xce   :  { %v372_v39 = vsel %vm295_vm4, %v371_v21, %v367_v35 }
  0xcf   :  { %v850_v51 = vpop.xlane.xlu1 %197  ;;  %v381_v36 = vsel %vm281_vm2, %v380_v19, %v376_v26 }
  0xd0   :  { %v190_v54 = vpop.xlane.xlu0 %189  ;;  %v395_v32 = vrot.slane %v850_v51, %v844_v47 }
  0xd1   :  { %v385_v22 = vrot.slane %v190_v54, %v840_v45 }
  0xd3   :  { %v194_v61 = vpop.xlane.xlu1 %193  ;;  %v386_v40 = vsel %vm288_vm3, %v385_v22, %v381_v36 }
  0xd4   :  { %v202_v2 = vpop.xlane.xlu0 %201  ;;  %v390_v27 = vrot.slane %v194_v61, %v846_v48  ;;  %v614_v61 = vld [vmem:[%s938_s2] ss:$0 sm:$0xff] }
  0xd5   :  { %v399_v23 = vrot.slane %v202_v2, %v836_v43  ;;  %v616_v2 = vld [vmem:[%s940_s4] ss:$0 sm:$0xff] }
  0xd6   :  { %v391_v44 = vsel %vm295_vm4, %v390_v27, %v386_v40 }
  0xd7   :  { %v214_v7 = vpop.xlane.xlu1 %213  ;;  %v400_v41 = vsel %vm281_vm2, %v399_v23, %v395_v32 }
  0xd8   :  { %v206_v11 = vpop.xlane.xlu0 %205  ;;  %v414_v46 = vrot.slane %v214_v7, %v844_v47 }
  0xd9   :  { %v404_v28 = vrot.slane %v206_v11, %v840_v45 }
  0xdb   :  { %v210_v24 = vpop.xlane.xlu1 %209  ;;  %v405_v49 = vsel %vm288_vm3, %v404_v28, %v400_v41 }
  0xdc   :  { %v218_v29 = vpop.xlane.xlu0 %217  ;;  %v409_v33 = vrot.slane %v210_v24, %v846_v48 }
  0xdd   :  { %v418_v37 = vrot.slane %v218_v29, %v836_v43  ;;  %v435_v43 = vsel %vm434_vm7, %v353_v34, %v433_v38 }
  0xde   :  { %v410_v52 = vsel %vm295_vm4, %v409_v33, %v405_v49  ;;  %v437_v54 = vsel %vm436_vm8, %v372_v39, %v435_v43 }
  0xdf   :  { %v226_v42 = vpop.xlane.xlu1 %225  ;;  %v419_v55 = vsel %vm281_vm2, %v418_v37, %v414_v46  ;;  %v439_v56 = vsel %vm438_vm9, %v391_v44, %v437_v54 }
  0xe0   :  { %v222_v50 = vpop.xlane.xlu0 %221  ;;  %v428_v51 = vrot.slane %v226_v42, %v846_v48  ;;  %v441_v48 = vsel %vm440_vm10, %v410_v52, %v439_v56 }
  0xe1   :  { %v423_v53 = vrot.slane %v222_v50, %v840_v45  ;;  %v524_v45 = vld [vmem:[%s939_s3 + $0x30] sm:$0xff] }
  0xe2   :  { %v678_v60 = vpack.c.bf16 %v525_v59, %v524_v45 }
  0xe3   :  { %v424_v47 = vsel %vm288_vm3, %v423_v53, %v419_v55 }
  0xe4   :  { %v429_v57 = vsel %vm295_vm4, %v428_v51, %v424_v47  ;;  %679 = vmatpush3.bf16.msra.mxu1 %v678_v60 }
  0xe5   :  { %v443_v58 = vsel %vm442_vm11, %v429_v57, %v441_v48 }
  0xe6   :  { %641 = vmatmul.mubr.msk.f32.vlgmr.msra.gmra.mrb[0].mxu0 %vm444_vm12, %v443_v58 }
 0x1b9   :  { %v513_v62 = vpop.f32.mrb[0].mxu0 }
 0x1ba   :  { %v514_v63 = vadd.f32 %v614_v61, %v513_v62  ;;  %v642_v0 = vpop.f32.mrb[1].mxu0 }
 0x1bc   :  { %v517_v1 = vmax.f32 %v514_v63, 0.0 }
 0x1be   :  { %660 = vmatmul.mubr.msk.f32.vlgmr.msra.gmra.mrb[0].mxu1 %vm533_vm13, %v517_v1 }
 0x291   :  { %v603_v3 = vpop.f32.mrb[0].mxu1 }
 0x292   :  { %v604_v4 = vadd.f32 %v616_v2, %v603_v3  ;;  %v661_v5 = vpop.f32.mrb[1].mxu1 }
 0x294   :  { %608 = vst.msk [vmem:[%s941_s5] sm:$0xff] %vm607_vm14, %v604_v4 }
 0x295   :  { %613 = vsyncpa [#allocation3], 1 }

</bundles_post_ra>
